<compile_context>
chip_gen: v6e
topology: v6e:2x2x1
jax: 0.10.0
libtpu: 0.0.40
codegen_flags: <defaults>
</compile_context>

<pallas_src>
import jax
import jax.numpy as jnp
from jax.experimental import pallas as pl
from jax.experimental.pallas import tpu as pltpu

_IN = 3
_HID = 9
_LANE = 512            # lane width of the batch slab (multiple of 128)
_SUBLANE = 8
_MAX_TILE_ROWS = 512   # up to 512*512 = 262144 batch rows / grid step (~4 MiB f32)
_TARGET_STEPS = 8      # aim for >=8 grid steps -> DMA pipelining + both v7x TCs busy


def _round_up(a, b):
    return ((a + b - 1) // b) * b


def _bc_kernel(w1_ref, b1_ref, w2_ref, b2_ref, x_ref, o_ref):
    # x_ref: [3, R_TILE, LANE] in VMEM -- one lane-dense plane per input feature,
    # batch index b lives at (b // LANE, b % LANE).  Weights/biases are SMEM
    # scalars, resident across the whole grid.
    x0 = x_ref[0]                     # [R_TILE, LANE]
    x1 = x_ref[1]
    x2 = x_ref[2]
    y = jnp.zeros_like(x0)
    # fc1 + relu + fc2 as unrolled VPU broadcast-FMAs over the lane-dense batch.
    for j in range(_HID):
        h = (w1_ref[0, j] * x0 + w1_ref[1, j] * x1 + w1_ref[2, j] * x2
             + b1_ref[0, j])
        h = jnp.maximum(h, 0.0)                      # relu (VPU)
        y = y + w2_ref[0, j] * h
    y = y + b2_ref[0, 0]
    o_ref[...] = jnp.tanh(y) * 2.0                   # tanh -> EUP slot, *2 -> VPU


def behavior_cloning_forward(x, w1, b1, w2, b2):
    """x: [B, 3]; w1: [3, 9]; b1: [1, 9]; w2: [9, 1]; b2: [1, 1] -> [B, 1]."""
    B = x.shape[0]
    x = x.astype(jnp.float32)

    # Tile / grid selection: R (slab rows) is a multiple of 8 sublanes; r_tile is
    # sized so the 1-D parallel grid has ~TARGET_STEPS steps (double-buffered
    # pipelining, and >=2 tiles per TensorCore on v7x for medium/large batches),
    # capped at 512 rows (~8 MiB double-buffered working set -> fits the default
    # scoped-VMEM limit on every generation).  Tiny batches collapse to 1 step,
    # where launch overhead dominates anyway.
    rows0 = _round_up(max(_SUBLANE, pl.cdiv(B, _LANE)), _SUBLANE)
    r_tile = min(_MAX_TILE_ROWS,
                 _round_up(pl.cdiv(rows0, _TARGET_STEPS), _SUBLANE))
    rows = _round_up(rows0, r_tile)
    steps = rows // r_tile
    padded_b = rows * _LANE

    # Single XLA relayout pass: batch b -> slab position (b // LANE, b % LANE).
    # Kept deliberately (see header): one bandwidth-bound pass here is cheaper
    # than any in-kernel relayout of 43x-lane-sparse natural [TILE_B, 3] tiles.
    xt = jnp.pad(jnp.transpose(x), ((0, 0), (0, padded_b - B)))
    x_slab = xt.reshape(_IN, rows, _LANE)

    w1_f = w1.astype(jnp.float32)                        # [3, 9]
    b1_row = jnp.reshape(b1, (1, _HID)).astype(jnp.float32)
    w2_row = jnp.reshape(w2, (1, _HID)).astype(jnp.float32)
    b2_s = jnp.reshape(b2, (1, 1)).astype(jnp.float32)

    # Whole-array SMEM blocks with a constant (grid-invariant) block index:
    # Pallas fetches them once; no per-step re-DMA of the 36 weight scalars.
    smem_spec = pl.BlockSpec(memory_space=pltpu.MemorySpace.SMEM)

    flops_per_row = 2 * _IN * _HID + _HID + 2 * _HID + 2   # fc1 + relu + fc2 + scale
    out_slab = pl.pallas_call(
        _bc_kernel,
        out_shape=jax.ShapeDtypeStruct((rows, _LANE), jnp.float32),
        grid=(steps,),
        in_specs=[
            smem_spec,                                       # w1 [3, 9]
            smem_spec,                                       # b1 [1, 9]
            smem_spec,                                       # w2 [1, 9]
            smem_spec,                                       # b2 [1, 1]
            pl.BlockSpec((_IN, r_tile, _LANE), lambda i: (0, i, 0)),
        ],
        out_specs=pl.BlockSpec((r_tile, _LANE), lambda i: (i, 0)),
        compiler_params=pltpu.CompilerParams(
            dimension_semantics=("parallel",)),
        cost_estimate=pl.CostEstimate(
            flops=flops_per_row * padded_b,
            transcendentals=padded_b,
            bytes_accessed=(_IN + 1) * 4 * padded_b),
    )(w1_f, b1_row, w2_row, b2_s, x_slab)

    # Free reshape; the [:B] slice only copies the B output floats.
    return out_slab.reshape(padded_b)[:B].reshape(B, 1)


def init_params(key):
    # Deterministic init mimicking nn.Linear's uniform(-1/sqrt(fan_in), +1/sqrt(fan_in)).
    k1, k2, k3, k4 = jax.random.split(key, 4)
    bound1 = 1.0 / jnp.sqrt(3.0)
    bound2 = 1.0 / jnp.sqrt(9.0)
    w1 = jax.random.uniform(k1, (3, 9), jnp.float32, -bound1, bound1)   # [in, out]
    b1 = jax.random.uniform(k2, (1, 9), jnp.float32, -bound1, bound1)
    w2 = jax.random.uniform(k3, (9, 1), jnp.float32, -bound2, bound2)   # [in, out]
    b2 = jax.random.uniform(k4, (1, 1), jnp.float32, -bound2, bound2)
    return w1, b1, w2, b2


if __name__ == "__main__":
    key = jax.random.PRNGKey(0)
    kx, kp = jax.random.split(key)
    B = 8
    x = jax.random.normal(kx, (B, 3), jnp.float32)
    w1, b1, w2, b2 = init_params(kp)

    out = behavior_cloning_forward(x, w1, b1, w2, b2)
    out = jax.block_until_ready(out)

    # Pure-JAX reference check (f32 parity with the PyTorch forward).
    ref = jnp.tanh(jnp.maximum(x @ w1 + b1, 0.0) @ w2 + b2) * 2.0
    assert out.shape == (B, 1)
    assert jnp.allclose(out, ref, atol=1e-5, rtol=1e-5)

    print("KERNEL_OK")
</pallas_src>

<mosaic_0001>
module attributes {stable_mosaic.version = 11 : i64} {
  func.func @_bc_kernel(%arg0: i32, %arg1: memref<3x9xf32, #tpu.memory_space<smem>>, %arg2: memref<1x9xf32, #tpu.memory_space<smem>>, %arg3: memref<1x9xf32, #tpu.memory_space<smem>>, %arg4: memref<1x1xf32, #tpu.memory_space<smem>>, %arg5: memref<3x8x512xf32, #tpu.memory_space<vmem>>, %arg6: memref<8x512xf32, #tpu.memory_space<vmem>>) attributes {dimension_semantics = [#tpu.dimension_semantics<parallel>], iteration_bounds = array<i64: 1>, scalar_prefetch = 0 : i64, scratch_operands = 0 : i64, tpu.core_type = #tpu.core_type<tc>, window_params = [{transform_indices = @transform_0, window_bounds = array<i64: 3, 9>}, {transform_indices = @transform_1, window_bounds = array<i64: 1, 9>}, {transform_indices = @transform_2, window_bounds = array<i64: 1, 9>}, {transform_indices = @transform_3, window_bounds = array<i64: 1, 1>}, {transform_indices = @transform_4, window_bounds = array<i64: 3, 8, 512>}, {transform_indices = @transform_5, window_bounds = array<i64: 8, 512>}]} {
    %c0 = arith.constant 0 : index
    %c0_0 = arith.constant 0 : index
    %c0_1 = arith.constant 0 : index
    %0 = vector.load %arg5[%c0, %c0_0, %c0_1] : memref<3x8x512xf32, #tpu.memory_space<vmem>>, vector<1x8x512xf32>
    %1 = vector.shape_cast %0 : vector<1x8x512xf32> to vector<8x512xf32>
    %c1 = arith.constant 1 : index
    %c0_2 = arith.constant 0 : index
    %c0_3 = arith.constant 0 : index
    %2 = vector.load %arg5[%c1, %c0_2, %c0_3] : memref<3x8x512xf32, #tpu.memory_space<vmem>>, vector<1x8x512xf32>
    %3 = vector.shape_cast %2 : vector<1x8x512xf32> to vector<8x512xf32>
    %c2 = arith.constant 2 : index
    %c0_4 = arith.constant 0 : index
    %c0_5 = arith.constant 0 : index
    %4 = vector.load %arg5[%c2, %c0_4, %c0_5] : memref<3x8x512xf32, #tpu.memory_space<vmem>>, vector<1x8x512xf32>
    %5 = vector.shape_cast %4 : vector<1x8x512xf32> to vector<8x512xf32>
    %cst = arith.constant 0.000000e+00 : f32
    %6 = vector.broadcast %cst : f32 to vector<8x512xf32>
    %c0_6 = arith.constant 0 : index
    %c0_7 = arith.constant 0 : index
    %7 = memref.load %arg1[%c0_6, %c0_7] : memref<3x9xf32, #tpu.memory_space<smem>>
    %8 = vector.broadcast %7 : f32 to vector<8x512xf32>
    %9 = arith.mulf %8, %1 : vector<8x512xf32>
    %c1_8 = arith.constant 1 : index
    %c0_9 = arith.constant 0 : index
    %10 = memref.load %arg1[%c1_8, %c0_9] : memref<3x9xf32, #tpu.memory_space<smem>>
    %11 = vector.broadcast %10 : f32 to vector<8x512xf32>
    %12 = arith.mulf %11, %3 : vector<8x512xf32>
    %13 = arith.addf %9, %12 : vector<8x512xf32>
    %c2_10 = arith.constant 2 : index
    %c0_11 = arith.constant 0 : index
    %14 = memref.load %arg1[%c2_10, %c0_11] : memref<3x9xf32, #tpu.memory_space<smem>>
    %15 = vector.broadcast %14 : f32 to vector<8x512xf32>
    %16 = arith.mulf %15, %5 : vector<8x512xf32>
    %17 = arith.addf %13, %16 : vector<8x512xf32>
    %c0_12 = arith.constant 0 : index
    %c0_13 = arith.constant 0 : index
    %18 = memref.load %arg2[%c0_12, %c0_13] : memref<1x9xf32, #tpu.memory_space<smem>>
    %19 = vector.broadcast %18 : f32 to vector<8x512xf32>
    %20 = arith.addf %17, %19 : vector<8x512xf32>
    %cst_14 = arith.constant 0.000000e+00 : f32
    %21 = vector.broadcast %cst_14 : f32 to vector<8x512xf32>
    %22 = arith.maximumf %20, %21 : vector<8x512xf32>
    %c0_15 = arith.constant 0 : index
    %c0_16 = arith.constant 0 : index
    %23 = memref.load %arg3[%c0_15, %c0_16] : memref<1x9xf32, #tpu.memory_space<smem>>
    %24 = vector.broadcast %23 : f32 to vector<8x512xf32>
    %25 = arith.mulf %24, %22 : vector<8x512xf32>
    %26 = arith.addf %6, %25 : vector<8x512xf32>
    %c0_17 = arith.constant 0 : index
    %c1_18 = arith.constant 1 : index
    %27 = memref.load %arg1[%c0_17, %c1_18] : memref<3x9xf32, #tpu.memory_space<smem>>
    %28 = vector.broadcast %27 : f32 to vector<8x512xf32>
    %29 = arith.mulf %28, %1 : vector<8x512xf32>
    %c1_19 = arith.constant 1 : index
    %c1_20 = arith.constant 1 : index
    %30 = memref.load %arg1[%c1_19, %c1_20] : memref<3x9xf32, #tpu.memory_space<smem>>
    %31 = vector.broadcast %30 : f32 to vector<8x512xf32>
    %32 = arith.mulf %31, %3 : vector<8x512xf32>
    %33 = arith.addf %29, %32 : vector<8x512xf32>
    %c2_21 = arith.constant 2 : index
    %c1_22 = arith.constant 1 : index
    %34 = memref.load %arg1[%c2_21, %c1_22] : memref<3x9xf32, #tpu.memory_space<smem>>
    %35 = vector.broadcast %34 : f32 to vector<8x512xf32>
    %36 = arith.mulf %35, %5 : vector<8x512xf32>
    %37 = arith.addf %33, %36 : vector<8x512xf32>
    %c0_23 = arith.constant 0 : index
    %c1_24 = arith.constant 1 : index
    %38 = memref.load %arg2[%c0_23, %c1_24] : memref<1x9xf32, #tpu.memory_space<smem>>
    %39 = vector.broadcast %38 : f32 to vector<8x512xf32>
    %40 = arith.addf %37, %39 : vector<8x512xf32>
    %cst_25 = arith.constant 0.000000e+00 : f32
    %41 = vector.broadcast %cst_25 : f32 to vector<8x512xf32>
    %42 = arith.maximumf %40, %41 : vector<8x512xf32>
    %c0_26 = arith.constant 0 : index
    %c1_27 = arith.constant 1 : index
    %43 = memref.load %arg3[%c0_26, %c1_27] : memref<1x9xf32, #tpu.memory_space<smem>>
    %44 = vector.broadcast %43 : f32 to vector<8x512xf32>
    %45 = arith.mulf %44, %42 : vector<8x512xf32>
    %46 = arith.addf %26, %45 : vector<8x512xf32>
    %c0_28 = arith.constant 0 : index
    %c2_29 = arith.constant 2 : index
    %47 = memref.load %arg1[%c0_28, %c2_29] : memref<3x9xf32, #tpu.memory_space<smem>>
    %48 = vector.broadcast %47 : f32 to vector<8x512xf32>
    %49 = arith.mulf %48, %1 : vector<8x512xf32>
    %c1_30 = arith.constant 1 : index
    %c2_31 = arith.constant 2 : index
    %50 = memref.load %arg1[%c1_30, %c2_31] : memref<3x9xf32, #tpu.memory_space<smem>>
    %51 = vector.broadcast %50 : f32 to vector<8x512xf32>
    %52 = arith.mulf %51, %3 : vector<8x512xf32>
    %53 = arith.addf %49, %52 : vector<8x512xf32>
    %c2_32 = arith.constant 2 : index
    %c2_33 = arith.constant 2 : index
    %54 = memref.load %arg1[%c2_32, %c2_33] : memref<3x9xf32, #tpu.memory_space<smem>>
    %55 = vector.broadcast %54 : f32 to vector<8x512xf32>
    %56 = arith.mulf %55, %5 : vector<8x512xf32>
    %57 = arith.addf %53, %56 : vector<8x512xf32>
    %c0_34 = arith.constant 0 : index
    %c2_35 = arith.constant 2 : index
    %58 = memref.load %arg2[%c0_34, %c2_35] : memref<1x9xf32, #tpu.memory_space<smem>>
    %59 = vector.broadcast %58 : f32 to vector<8x512xf32>
    %60 = arith.addf %57, %59 : vector<8x512xf32>
    %cst_36 = arith.constant 0.000000e+00 : f32
    %61 = vector.broadcast %cst_36 : f32 to vector<8x512xf32>
    %62 = arith.maximumf %60, %61 : vector<8x512xf32>
    %c0_37 = arith.constant 0 : index
    %c2_38 = arith.constant 2 : index
    %63 = memref.load %arg3[%c0_37, %c2_38] : memref<1x9xf32, #tpu.memory_space<smem>>
    %64 = vector.broadcast %63 : f32 to vector<8x512xf32>
    %65 = arith.mulf %64, %62 : vector<8x512xf32>
    %66 = arith.addf %46, %65 : vector<8x512xf32>
    %c0_39 = arith.constant 0 : index
    %c3 = arith.constant 3 : index
    %67 = memref.load %arg1[%c0_39, %c3] : memref<3x9xf32, #tpu.memory_space<smem>>
    %68 = vector.broadcast %67 : f32 to vector<8x512xf32>
    %69 = arith.mulf %68, %1 : vector<8x512xf32>
    %c1_40 = arith.constant 1 : index
    %c3_41 = arith.constant 3 : index
    %70 = memref.load %arg1[%c1_40, %c3_41] : memref<3x9xf32, #tpu.memory_space<smem>>
    %71 = vector.broadcast %70 : f32 to vector<8x512xf32>
    %72 = arith.mulf %71, %3 : vector<8x512xf32>
    %73 = arith.addf %69, %72 : vector<8x512xf32>
    %c2_42 = arith.constant 2 : index
    %c3_43 = arith.constant 3 : index
    %74 = memref.load %arg1[%c2_42, %c3_43] : memref<3x9xf32, #tpu.memory_space<smem>>
    %75 = vector.broadcast %74 : f32 to vector<8x512xf32>
    %76 = arith.mulf %75, %5 : vector<8x512xf32>
    %77 = arith.addf %73, %76 : vector<8x512xf32>
    %c0_44 = arith.constant 0 : index
    %c3_45 = arith.constant 3 : index
    %78 = memref.load %arg2[%c0_44, %c3_45] : memref<1x9xf32, #tpu.memory_space<smem>>
    %79 = vector.broadcast %78 : f32 to vector<8x512xf32>
    %80 = arith.addf %77, %79 : vector<8x512xf32>
    %cst_46 = arith.constant 0.000000e+00 : f32
    %81 = vector.broadcast %cst_46 : f32 to vector<8x512xf32>
    %82 = arith.maximumf %80, %81 : vector<8x512xf32>
    %c0_47 = arith.constant 0 : index
    %c3_48 = arith.constant 3 : index
    %83 = memref.load %arg3[%c0_47, %c3_48] : memref<1x9xf32, #tpu.memory_space<smem>>
    %84 = vector.broadcast %83 : f32 to vector<8x512xf32>
    %85 = arith.mulf %84, %82 : vector<8x512xf32>
    %86 = arith.addf %66, %85 : vector<8x512xf32>
    %c0_49 = arith.constant 0 : index
    %c4 = arith.constant 4 : index
    %87 = memref.load %arg1[%c0_49, %c4] : memref<3x9xf32, #tpu.memory_space<smem>>
    %88 = vector.broadcast %87 : f32 to vector<8x512xf32>
    %89 = arith.mulf %88, %1 : vector<8x512xf32>
    %c1_50 = arith.constant 1 : index
    %c4_51 = arith.constant 4 : index
    %90 = memref.load %arg1[%c1_50, %c4_51] : memref<3x9xf32, #tpu.memory_space<smem>>
    %91 = vector.broadcast %90 : f32 to vector<8x512xf32>
    %92 = arith.mulf %91, %3 : vector<8x512xf32>
    %93 = arith.addf %89, %92 : vector<8x512xf32>
    %c2_52 = arith.constant 2 : index
    %c4_53 = arith.constant 4 : index
    %94 = memref.load %arg1[%c2_52, %c4_53] : memref<3x9xf32, #tpu.memory_space<smem>>
    %95 = vector.broadcast %94 : f32 to vector<8x512xf32>
    %96 = arith.mulf %95, %5 : vector<8x512xf32>
    %97 = arith.addf %93, %96 : vector<8x512xf32>
    %c0_54 = arith.constant 0 : index
    %c4_55 = arith.constant 4 : index
    %98 = memref.load %arg2[%c0_54, %c4_55] : memref<1x9xf32, #tpu.memory_space<smem>>
    %99 = vector.broadcast %98 : f32 to vector<8x512xf32>
    %100 = arith.addf %97, %99 : vector<8x512xf32>
    %cst_56 = arith.constant 0.000000e+00 : f32
    %101 = vector.broadcast %cst_56 : f32 to vector<8x512xf32>
    %102 = arith.maximumf %100, %101 : vector<8x512xf32>
    %c0_57 = arith.constant 0 : index
    %c4_58 = arith.constant 4 : index
    %103 = memref.load %arg3[%c0_57, %c4_58] : memref<1x9xf32, #tpu.memory_space<smem>>
    %104 = vector.broadcast %103 : f32 to vector<8x512xf32>
    %105 = arith.mulf %104, %102 : vector<8x512xf32>
    %106 = arith.addf %86, %105 : vector<8x512xf32>
    %c0_59 = arith.constant 0 : index
    %c5 = arith.constant 5 : index
    %107 = memref.load %arg1[%c0_59, %c5] : memref<3x9xf32, #tpu.memory_space<smem>>
    %108 = vector.broadcast %107 : f32 to vector<8x512xf32>
    %109 = arith.mulf %108, %1 : vector<8x512xf32>
    %c1_60 = arith.constant 1 : index
    %c5_61 = arith.constant 5 : index
    %110 = memref.load %arg1[%c1_60, %c5_61] : memref<3x9xf32, #tpu.memory_space<smem>>
    %111 = vector.broadcast %110 : f32 to vector<8x512xf32>
    %112 = arith.mulf %111, %3 : vector<8x512xf32>
    %113 = arith.addf %109, %112 : vector<8x512xf32>
    %c2_62 = arith.constant 2 : index
    %c5_63 = arith.constant 5 : index
    %114 = memref.load %arg1[%c2_62, %c5_63] : memref<3x9xf32, #tpu.memory_space<smem>>
    %115 = vector.broadcast %114 : f32 to vector<8x512xf32>
    %116 = arith.mulf %115, %5 : vector<8x512xf32>
    %117 = arith.addf %113, %116 : vector<8x512xf32>
    %c0_64 = arith.constant 0 : index
    %c5_65 = arith.constant 5 : index
    %118 = memref.load %arg2[%c0_64, %c5_65] : memref<1x9xf32, #tpu.memory_space<smem>>
    %119 = vector.broadcast %118 : f32 to vector<8x512xf32>
    %120 = arith.addf %117, %119 : vector<8x512xf32>
    %cst_66 = arith.constant 0.000000e+00 : f32
    %121 = vector.broadcast %cst_66 : f32 to vector<8x512xf32>
    %122 = arith.maximumf %120, %121 : vector<8x512xf32>
    %c0_67 = arith.constant 0 : index
    %c5_68 = arith.constant 5 : index
    %123 = memref.load %arg3[%c0_67, %c5_68] : memref<1x9xf32, #tpu.memory_space<smem>>
    %124 = vector.broadcast %123 : f32 to vector<8x512xf32>
    %125 = arith.mulf %124, %122 : vector<8x512xf32>
    %126 = arith.addf %106, %125 : vector<8x512xf32>
    %c0_69 = arith.constant 0 : index
    %c6 = arith.constant 6 : index
    %127 = memref.load %arg1[%c0_69, %c6] : memref<3x9xf32, #tpu.memory_space<smem>>
    %128 = vector.broadcast %127 : f32 to vector<8x512xf32>
    %129 = arith.mulf %128, %1 : vector<8x512xf32>
    %c1_70 = arith.constant 1 : index
    %c6_71 = arith.constant 6 : index
    %130 = memref.load %arg1[%c1_70, %c6_71] : memref<3x9xf32, #tpu.memory_space<smem>>
    %131 = vector.broadcast %130 : f32 to vector<8x512xf32>
    %132 = arith.mulf %131, %3 : vector<8x512xf32>
    %133 = arith.addf %129, %132 : vector<8x512xf32>
    %c2_72 = arith.constant 2 : index
    %c6_73 = arith.constant 6 : index
    %134 = memref.load %arg1[%c2_72, %c6_73] : memref<3x9xf32, #tpu.memory_space<smem>>
    %135 = vector.broadcast %134 : f32 to vector<8x512xf32>
    %136 = arith.mulf %135, %5 : vector<8x512xf32>
    %137 = arith.addf %133, %136 : vector<8x512xf32>
    %c0_74 = arith.constant 0 : index
    %c6_75 = arith.constant 6 : index
    %138 = memref.load %arg2[%c0_74, %c6_75] : memref<1x9xf32, #tpu.memory_space<smem>>
    %139 = vector.broadcast %138 : f32 to vector<8x512xf32>
    %140 = arith.addf %137, %139 : vector<8x512xf32>
    %cst_76 = arith.constant 0.000000e+00 : f32
    %141 = vector.broadcast %cst_76 : f32 to vector<8x512xf32>
    %142 = arith.maximumf %140, %141 : vector<8x512xf32>
    %c0_77 = arith.constant 0 : index
    %c6_78 = arith.constant 6 : index
    %143 = memref.load %arg3[%c0_77, %c6_78] : memref<1x9xf32, #tpu.memory_space<smem>>
    %144 = vector.broadcast %143 : f32 to vector<8x512xf32>
    %145 = arith.mulf %144, %142 : vector<8x512xf32>
    %146 = arith.addf %126, %145 : vector<8x512xf32>
    %c0_79 = arith.constant 0 : index
    %c7 = arith.constant 7 : index
    %147 = memref.load %arg1[%c0_79, %c7] : memref<3x9xf32, #tpu.memory_space<smem>>
    %148 = vector.broadcast %147 : f32 to vector<8x512xf32>
    %149 = arith.mulf %148, %1 : vector<8x512xf32>
    %c1_80 = arith.constant 1 : index
    %c7_81 = arith.constant 7 : index
    %150 = memref.load %arg1[%c1_80, %c7_81] : memref<3x9xf32, #tpu.memory_space<smem>>
    %151 = vector.broadcast %150 : f32 to vector<8x512xf32>
    %152 = arith.mulf %151, %3 : vector<8x512xf32>
    %153 = arith.addf %149, %152 : vector<8x512xf32>
    %c2_82 = arith.constant 2 : index
    %c7_83 = arith.constant 7 : index
    %154 = memref.load %arg1[%c2_82, %c7_83] : memref<3x9xf32, #tpu.memory_space<smem>>
    %155 = vector.broadcast %154 : f32 to vector<8x512xf32>
    %156 = arith.mulf %155, %5 : vector<8x512xf32>
    %157 = arith.addf %153, %156 : vector<8x512xf32>
    %c0_84 = arith.constant 0 : index
    %c7_85 = arith.constant 7 : index
    %158 = memref.load %arg2[%c0_84, %c7_85] : memref<1x9xf32, #tpu.memory_space<smem>>
    %159 = vector.broadcast %158 : f32 to vector<8x512xf32>
    %160 = arith.addf %157, %159 : vector<8x512xf32>
    %cst_86 = arith.constant 0.000000e+00 : f32
    %161 = vector.broadcast %cst_86 : f32 to vector<8x512xf32>
    %162 = arith.maximumf %160, %161 : vector<8x512xf32>
    %c0_87 = arith.constant 0 : index
    %c7_88 = arith.constant 7 : index
    %163 = memref.load %arg3[%c0_87, %c7_88] : memref<1x9xf32, #tpu.memory_space<smem>>
    %164 = vector.broadcast %163 : f32 to vector<8x512xf32>
    %165 = arith.mulf %164, %162 : vector<8x512xf32>
    %166 = arith.addf %146, %165 : vector<8x512xf32>
    %c0_89 = arith.constant 0 : index
    %c8 = arith.constant 8 : index
    %167 = memref.load %arg1[%c0_89, %c8] : memref<3x9xf32, #tpu.memory_space<smem>>
    %168 = vector.broadcast %167 : f32 to vector<8x512xf32>
    %169 = arith.mulf %168, %1 : vector<8x512xf32>
    %c1_90 = arith.constant 1 : index
    %c8_91 = arith.constant 8 : index
    %170 = memref.load %arg1[%c1_90, %c8_91] : memref<3x9xf32, #tpu.memory_space<smem>>
    %171 = vector.broadcast %170 : f32 to vector<8x512xf32>
    %172 = arith.mulf %171, %3 : vector<8x512xf32>
    %173 = arith.addf %169, %172 : vector<8x512xf32>
    %c2_92 = arith.constant 2 : index
    %c8_93 = arith.constant 8 : index
    %174 = memref.load %arg1[%c2_92, %c8_93] : memref<3x9xf32, #tpu.memory_space<smem>>
    %175 = vector.broadcast %174 : f32 to vector<8x512xf32>
    %176 = arith.mulf %175, %5 : vector<8x512xf32>
    %177 = arith.addf %173, %176 : vector<8x512xf32>
    %c0_94 = arith.constant 0 : index
    %c8_95 = arith.constant 8 : index
    %178 = memref.load %arg2[%c0_94, %c8_95] : memref<1x9xf32, #tpu.memory_space<smem>>
    %179 = vector.broadcast %178 : f32 to vector<8x512xf32>
    %180 = arith.addf %177, %179 : vector<8x512xf32>
    %cst_96 = arith.constant 0.000000e+00 : f32
    %181 = vector.broadcast %cst_96 : f32 to vector<8x512xf32>
    %182 = arith.maximumf %180, %181 : vector<8x512xf32>
    %c0_97 = arith.constant 0 : index
    %c8_98 = arith.constant 8 : index
    %183 = memref.load %arg3[%c0_97, %c8_98] : memref<1x9xf32, #tpu.memory_space<smem>>
    %184 = vector.broadcast %183 : f32 to vector<8x512xf32>
    %185 = arith.mulf %184, %182 : vector<8x512xf32>
    %186 = arith.addf %166, %185 : vector<8x512xf32>
    %c0_99 = arith.constant 0 : index
    %c0_100 = arith.constant 0 : index
    %187 = memref.load %arg4[%c0_99, %c0_100] : memref<1x1xf32, #tpu.memory_space<smem>>
    %188 = vector.broadcast %187 : f32 to vector<8x512xf32>
    %189 = arith.addf %186, %188 : vector<8x512xf32>
    %190 = math.tanh %189 : vector<8x512xf32>
    %cst_101 = arith.constant 2.000000e+00 : f32
    %191 = vector.broadcast %cst_101 : f32 to vector<8x512xf32>
    %192 = arith.mulf %190, %191 : vector<8x512xf32>
    %c0_102 = arith.constant 0 : index
    %c0_103 = arith.constant 0 : index
    %193 = vector.load %arg6[%c0_102, %c0_103] : memref<8x512xf32, #tpu.memory_space<vmem>>, vector<8x512xf32>
    tpu.vector_store %arg6[%c0_102, %c0_103], %192 {strides = array<i32>} : memref<8x512xf32, #tpu.memory_space<vmem>>, vector<8x512xf32>,
    return
  }
  func.func @transform_0(%arg0: i32) -> (i32, i32) {
    %c0_i32 = arith.constant 0 : i32
    %c0_i32_0 = arith.constant 0 : i32
    %c0_i32_1 = arith.constant 0 : i32
    return %c0_i32, %c0_i32_0 : i32, i32
  }
  func.func @transform_1(%arg0: i32) -> (i32, i32) {
    %c0_i32 = arith.constant 0 : i32
    %c0_i32_0 = arith.constant 0 : i32
    %c0_i32_1 = arith.constant 0 : i32
    return %c0_i32, %c0_i32_0 : i32, i32
  }
  func.func @transform_2(%arg0: i32) -> (i32, i32) {
    %c0_i32 = arith.constant 0 : i32
    %c0_i32_0 = arith.constant 0 : i32
    %c0_i32_1 = arith.constant 0 : i32
    return %c0_i32, %c0_i32_0 : i32, i32
  }
  func.func @transform_3(%arg0: i32) -> (i32, i32) {
    %c0_i32 = arith.constant 0 : i32
    %c0_i32_0 = arith.constant 0 : i32
    %c0_i32_1 = arith.constant 0 : i32
    return %c0_i32, %c0_i32_0 : i32, i32
  }
  func.func @transform_4(%arg0: i32) -> (i32, i32, i32) {
    %c0_i32 = arith.constant 0 : i32
    %c0_i32_0 = arith.constant 0 : i32
    %c0_i32_1 = arith.constant 0 : i32
    return %c0_i32, %arg0, %c0_i32_0 : i32, i32, i32
  }
  func.func @transform_5(%arg0: i32) -> (i32, i32) {
    %c0_i32 = arith.constant 0 : i32
    %c0_i32_0 = arith.constant 0 : i32
    return %arg0, %c0_i32 : i32, i32
  }
}

</mosaic_0001>

<bundles_post_ra>
// kernel: tpu_custom_call.1
= control target key start
LH: loop header
LB: loop body
LE: loop exit
PB: predicated region body
PF: predicated region fallthrough
CT: control target
= control target key end

     0   :  { %11 = vsyncpa [#allocation6], 0  ;;  %s993_s0 = inlined_call_operand.hbm [shape: f32[3,9], index: 0, kind: input, shape index: {}]   ;;  %s994_s1 = inlined_call_operand.vmem [shape: f32[1,9], index: 1, kind: input, shape index: {}]   ;;  %s995_s2 = inlined_call_operand.vmem [shape: f32[1,9], index: 2, kind: input, shape index: {}]   ;;  %s996_s3 = inlined_call_operand.<no memory space> [shape: f32[1,1], index: 3, kind: input, shape index: {}]   ;;  %s997_s4 = inlined_call_operand.hbm [shape: f32[3,8,512], index: 4, kind: input, shape index: {}]   ;;  %s998_s5 = inlined_call_operand.hbm [shape: f32[8,512], index: 5, kind: output, shape index: {}]  }
   0x1   :  { %12 = vsyncpa [#allocation7], 0 }
   0x2   :  { %13 = vsyncpa [#allocation10], 0 }
   0x3   :  { %14 = vsyncpa [#allocation4], 0 }
   0x4   :  { %15 = vsyncpa [#allocation5], 0  ;;  %s30_s20 = sshll.u32 %s994_s1, 4  ;;  %s674_s21 = smov [#allocation3]   ;;  %s31_s20 = int_to_ptr.vmem [resolvable:$true] %s30_s20 }
   0x5   :  { %23 = dma.hbm_to_smem %s993_s0, 64, %s674_s21, [#allocation6]  }
   0x6   :  { %s600_s24 = scalar_lea.vmem %s31_s20, 16  ;;  %p605_p1 = scmp.lt.s32.totalorder %s31_s20, %s31_s20 }
   0x7   :  { %p601_p0 = scmp.ne.s32.totalorder %s31_s20, %s600_s24  ;;  %p606_p2 = scmp.lt.s32.totalorder %s600_s24, %s600_s24 }
   0x9   :  { %p607_p3 = por %p606_p2, %p605_p1 }
   0xb   :  { %p608_p4 = pnand %p607_p3, %p601_p0 }
   0xd   :  { %611 = shalt.err (!%p608_p4)
}
   0xe   :  { %s675_s25 = smov [#allocation8]   ;;  %s40_s28 = sshll.u32 %s995_s2, 4  ;;  %s41_s28 = int_to_ptr.vmem [resolvable:$true] %s40_s28 }
   0xf   :  { %33 = dma.vmem_to_smem %s31_s20, 16, %s675_s25, [#allocation7]  }
  0x10   :  { %s612_s1 = scalar_lea.vmem %s41_s28, 16  ;;  %p617_p6 = scmp.lt.s32.totalorder %s41_s28, %s41_s28 }
  0x11   :  { %p613_p5 = scmp.ne.s32.totalorder %s41_s28, %s612_s1  ;;  %p618_p7 = scmp.lt.s32.totalorder %s612_s1, %s612_s1 }
  0x13   :  { %p619_p8 = por %p618_p7, %p617_p6 }
  0x15   :  { %p620_p9 = pnand %p619_p8, %p613_p5 }
  0x17   :  { %623 = shalt.err (!%p620_p9)
}
  0x18   :  { %s676_s0 = smov [#allocation9]   ;;  %s677_s29 = smov [#allocation11]  }
  0x19   :  { %43 = dma.vmem_to_smem %s41_s28, 16, %s676_s0, [#allocation10]  }
  0x1a   :  { %s51_s30 = sshll.u32 %s677_s29, 4  ;;  %s52_s30 = int_to_ptr.vmem [resolvable:$true] %s51_s30 }
  0x1b   :  { %s632_s6 = scalar_lea.vmem %s52_s30, 1536  ;;  %p637_p11 = scmp.lt.s32.totalorder %s52_s30, %s52_s30 }
  0x1c   :  { %p633_p10 = scmp.ne.s32.totalorder %s52_s30, %s632_s6  ;;  %p638_p12 = scmp.lt.s32.totalorder %s632_s6, %s632_s6 }
  0x1e   :  { %p639_p13 = por %p638_p12, %p637_p11 }
  0x20   :  { %p640_p0 = pnand %p639_p13, %p633_p10 }
  0x22   :  { %643 = shalt.err (!%p640_p0)
}
  0x23   :  { %s678_s2 = smov 512   ;;  %s679_s7 = smov 32  }
  0x24   :  { %57 = dma.hbm_to_vmem [thread:$0]  %s997_s4, 1536, %s52_s30, [#allocation4], %s678_s2, %s678_s2, %s679_s7  }
  0x25   :  { %664 = dma.done.wait [#allocation6], 64  }
  0x26   :  { %665 = vsyncadd [#allocation6], 4294967232 }
  0x27   :  { %666 = dma.done.wait [#allocation7], 16  }
  0x28   :  { %667 = vsyncadd [#allocation7], 4294967280 }
  0x29   :  { %668 = dma.done.wait [#allocation10], 16  }
  0x2a   :  { %669 = vsyncadd [#allocation10], 4294967280 }
  0x2b   :  { %670 = dma.done.wait [#allocation4], 1536  }
  0x2c   :  { %671 = vsyncadd [#allocation4], 4294965760 }
  0x2d   :  { %70 = sfence }
  0x2e   :  { %s85_s10 = sld [smem:[#allocation3]]  ;;  %v723_v0 = vld [vmem:[#allocation11] sm:$0xff]  ;;  %v727_v1 = vld [vmem:[#allocation11 + $0x8] sm:$0xff]  ;;  %v729_v2 = vld [vmem:[#allocation11 + $0x10] sm:$0xff] }
  0x2f   :  { %s535_s11 = sld [smem:[#allocation3 + $0x80]]  ;;  %v731_v3 = vld [vmem:[#allocation11 + $0x18] sm:$0xff]  ;;  %v735_v4 = vld [vmem:[#allocation11 + $0x20] sm:$0xff]  ;;  %v737_v5 = vld [vmem:[#allocation11 + $0x28] sm:$0xff] }
  0x30   :  { %s536_s12 = sld [smem:[#allocation3 + $0x100]]  ;;  %v741_v6 = vld [vmem:[#allocation11 + $0x30] sm:$0xff]  ;;  %v743_v7 = vld [vmem:[#allocation11 + $0x38] sm:$0xff]  ;;  %v745_v8 = vld [vmem:[#allocation11 + $0x40] sm:$0xff] }
  0x31   :  { %s725_s13 = sld [smem:[#allocation8]]  ;;  %v747_v10 = vld [vmem:[#allocation11 + $0x48] sm:$0xff]  ;;  %v749_v11 = vld [vmem:[#allocation11 + $0x50] sm:$0xff]  ;;  %v751_v12 = vld [vmem:[#allocation11 + $0x58] sm:$0xff] }
  0x32   :  { %s733_s4 = sld [smem:[#allocation9]] }
  0x33   :  { %s739_s14 = sld [smem:[#allocation3 + $0x1]] }
  0x34   :  { %v86_v9 = vstv %s85_s10  ;;  %s538_s15 = sld [smem:[#allocation3 + $0x81]] }
  0x35   :  { %v87_v13 = vmul.f32 %v86_v9, %v723_v0  ;;  %v88_v14 = vmul.f32 %v86_v9, %v727_v1  ;;  %v89_v15 = vmul.f32 %v86_v9, %v729_v2  ;;  %v90_v16 = vmul.f32 %v86_v9, %v731_v3  ;;  %s765_s16 = sld [smem:[#allocation3 + $0x101]] }
  0x36   :  { %v92_v17 = vstv %s535_s11  ;;  %v102_v18 = vstv %s536_s12  ;;  %s770_s17 = sld [smem:[#allocation3 + $0x2]] }
  0x37   :  { %v93_v19 = vmul.f32 %v92_v17, %v735_v4  ;;  %v94_v20 = vmul.f32 %v92_v17, %v737_v5  ;;  %v95_v21 = vmul.f32 %v92_v17, %v741_v6  ;;  %v96_v22 = vmul.f32 %v92_v17, %v743_v7  ;;  %s772_s18 = sld [smem:[#allocation8 + $0x1]] }
  0x38   :  { %v103_v23 = vmul.f32 %v102_v18, %v745_v8  ;;  %v104_v24 = vmul.f32 %v102_v18, %v747_v10  ;;  %v105_v25 = vmul.f32 %v102_v18, %v749_v11  ;;  %v106_v26 = vmul.f32 %v102_v18, %v751_v12  ;;  %s778_s19 = sld [smem:[#allocation9 + $0x1]] }
  0x39   :  { %v97_v27 = vadd.f32 %v93_v19, %v87_v13  ;;  %v98_v28 = vadd.f32 %v94_v20, %v88_v14  ;;  %v99_v29 = vadd.f32 %v95_v21, %v89_v15  ;;  %v100_v30 = vadd.f32 %v96_v22, %v90_v16  ;;  %s780_s20 = sld [smem:[#allocation3 + $0x82]] }
  0x3a   :  { %v112_v31 = vstv %s725_s13  ;;  %v122_v32 = vstv %s733_s4  ;;  %v132_v33 = vstv %s739_s14  ;;  %v138_v34 = vstv %s538_s15  ;;  %s786_s21 = sld [smem:[#allocation3 + $0x102]] }
  0x3b   :  { %v107_v35 = vadd.f32 %v103_v23, %v97_v27  ;;  %v108_v36 = vadd.f32 %v104_v24, %v98_v28  ;;  %v109_v37 = vadd.f32 %v105_v25, %v99_v29  ;;  %v110_v38 = vadd.f32 %v106_v26, %v100_v30  ;;  %s798_s22 = sld [smem:[#allocation8 + $0x2]] }
  0x3c   :  { %v133_v39 = vmul.f32 %v132_v33, %v723_v0  ;;  %v134_v40 = vmul.f32 %v132_v33, %v727_v1  ;;  %v135_v41 = vmul.f32 %v132_v33, %v729_v2  ;;  %v136_v42 = vmul.f32 %v132_v33, %v731_v3  ;;  %s800_s23 = sld [smem:[#allocation9 + $0x2]] }
  0x3d   :  { %v113_v43 = vadd.f32 %v112_v31, %v107_v35  ;;  %v114_v44 = vadd.f32 %v112_v31, %v108_v36  ;;  %v115_v45 = vadd.f32 %v112_v31, %v109_v37  ;;  %v116_v46 = vadd.f32 %v112_v31, %v110_v38  ;;  %s806_s24 = sld [smem:[#allocation3 + $0x3]] }
  0x3e   :  { %v139_v47 = vmul.f32 %v138_v34, %v735_v4  ;;  %v140_v48 = vmul.f32 %v138_v34, %v737_v5  ;;  %v141_v49 = vmul.f32 %v138_v34, %v741_v6  ;;  %v142_v50 = vmul.f32 %v138_v34, %v743_v7  ;;  %s808_s25 = sld [smem:[#allocation3 + $0x83]] }
  0x3f   :  { %v117_v51 = vmax.f32 %v113_v43, 0.0  ;;  %v118_v52 = vmax.f32 %v114_v44, 0.0  ;;  %v119_v53 = vmax.f32 %v115_v45, 0.0  ;;  %v120_v54 = vmax.f32 %v116_v46, 0.0  ;;  %s814_s26 = sld [smem:[#allocation3 + $0x103]] }
  0x40   :  { %v143_v55 = vadd.f32 %v139_v47, %v133_v39  ;;  %v144_v56 = vadd.f32 %v140_v48, %v134_v40  ;;  %v145_v59 = vadd.f32 %v141_v49, %v135_v41  ;;  %v146_v60 = vadd.f32 %v142_v50, %v136_v42  ;;  %s820_s27 = sld [smem:[#allocation8 + $0x3]] }
  0x41   :  { %v123_v57 = vmul.f32 %v122_v32, %v117_v51  ;;  %v124_v58 = vmul.f32 %v122_v32, %v118_v52  ;;  %v125_v61 = vmul.f32 %v122_v32, %v119_v53  ;;  %v126_v62 = vmul.f32 %v122_v32, %v120_v54  ;;  %s824_s28 = sld [smem:[#allocation9 + $0x3]] }
  0x42   :  { %v148_v63 = vstv %s765_s16  ;;  %v178_v9 = vstv %s770_s17  ;;  %v158_v17 = vstv %s772_s18  ;;  %v168_v18 = vstv %s778_s19  ;;  %s826_s1 = sld [smem:[#allocation3 + $0x4]] }
  0x43   :  { %v149_v13 = vmul.f32 %v148_v63, %v745_v8  ;;  %v150_v14 = vmul.f32 %v148_v63, %v747_v10  ;;  %v151_v15 = vmul.f32 %v148_v63, %v749_v11  ;;  %v152_v16 = vmul.f32 %v148_v63, %v751_v12  ;;  %s834_s0 = sld [smem:[#allocation3 + $0x84]] }
  0x44   :  { %v179_v19 = vmul.f32 %v178_v9, %v723_v0  ;;  %v180_v20 = vmul.f32 %v178_v9, %v727_v1  ;;  %v181_v25 = vmul.f32 %v178_v9, %v729_v2  ;;  %v182_v26 = vmul.f32 %v178_v9, %v731_v3  ;;  %s836_s29 = sld [smem:[#allocation3 + $0x104]] }
  0x45   :  { %v153_v21 = vadd.f32 %v149_v13, %v143_v55  ;;  %v154_v22 = vadd.f32 %v150_v14, %v144_v56  ;;  %v155_v23 = vadd.f32 %v151_v15, %v145_v59  ;;  %v156_v24 = vadd.f32 %v152_v16, %v146_v60  ;;  %s856_s30 = sld [smem:[#allocation8 + $0x4]] }
  0x46   :  { %v184_v27 = vstv %s780_s20  ;;  %v194_v28 = vstv %s786_s21  ;;  %v204_v55 = vstv %s798_s22  ;;  %v214_v56 = vstv %s800_s23  ;;  %s858_s6 = sld [smem:[#allocation9 + $0x4]] }
  0x47   :  { %v159_v29 = vadd.f32 %v158_v17, %v153_v21  ;;  %v160_v30 = vadd.f32 %v158_v17, %v154_v22  ;;  %v161_v31 = vadd.f32 %v158_v17, %v155_v23  ;;  %v162_v32 = vadd.f32 %v158_v17, %v156_v24  ;;  %s864_s2 = sld [smem:[#allocation3 + $0x5]] }
  0x48   :  { %v185_v33 = vmul.f32 %v184_v27, %v735_v4  ;;  %v186_v34 = vmul.f32 %v184_v27, %v737_v5  ;;  %v187_v35 = vmul.f32 %v184_v27, %v741_v6  ;;  %v188_v36 = vmul.f32 %v184_v27, %v743_v7  ;;  %s866_s7 = sld [smem:[#allocation3 + $0x85]] }
  0x49   :  { %v163_v37 = vmax.f32 %v159_v29, 0.0  ;;  %v164_v38 = vmax.f32 %v160_v30, 0.0  ;;  %v165_v39 = vmax.f32 %v161_v31, 0.0  ;;  %v166_v40 = vmax.f32 %v162_v32, 0.0  ;;  %s878_s8 = sld [smem:[#allocation3 + $0x105]] }
  0x4a   :  { %v189_v41 = vadd.f32 %v185_v33, %v179_v19  ;;  %v190_v42 = vadd.f32 %v186_v34, %v180_v20  ;;  %v191_v43 = vadd.f32 %v187_v35, %v181_v25  ;;  %v192_v44 = vadd.f32 %v188_v36, %v182_v26  ;;  %s884_s9 = sld [smem:[#allocation3 + $0x6]] }
  0x4b   :  { %v169_v45 = vmul.f32 %v168_v18, %v163_v37  ;;  %v170_v46 = vmul.f32 %v168_v18, %v164_v38  ;;  %v171_v47 = vmul.f32 %v168_v18, %v165_v39  ;;  %v172_v48 = vmul.f32 %v168_v18, %v166_v40  ;;  %s886_s10 = sld [smem:[#allocation8 + $0x5]] }
  0x4c   :  { %v195_v49 = vmul.f32 %v194_v28, %v745_v8  ;;  %v196_v50 = vmul.f32 %v194_v28, %v747_v10  ;;  %v197_v51 = vmul.f32 %v194_v28, %v749_v11  ;;  %v198_v52 = vmul.f32 %v194_v28, %v751_v12  ;;  %s892_s11 = sld [smem:[#allocation9 + $0x5]] }
  0x4d   :  { %v173_v53 = vadd.f32 %v169_v45, %v123_v57  ;;  %v174_v54 = vadd.f32 %v170_v46, %v124_v58  ;;  %v828_v13 = vadd.f32 %v171_v47, %v125_v61  ;;  %v830_v14 = vadd.f32 %v172_v48, %v126_v62  ;;  %s894_s12 = sld [smem:[#allocation3 + $0x86]] }
  0x4e   :  { %v199_v59 = vadd.f32 %v195_v49, %v189_v41  ;;  %v200_v60 = vadd.f32 %v196_v50, %v190_v42  ;;  %v201_v63 = vadd.f32 %v197_v51, %v191_v43  ;;  %v202_v9 = vadd.f32 %v198_v52, %v192_v44  ;;  %s900_s13 = sld [smem:[#allocation3 + $0x106]] }
  0x4f   :  { %v224_v15 = vstv %s806_s24  ;;  %v230_v16 = vstv %s808_s25  ;;  %v240_v31 = vstv %s814_s26  ;;  %v250_v32 = vstv %s820_s27  ;;  %s912_s4 = sld [smem:[#allocation8 + $0x6]]  ;;  %s680_s27 = smov [#allocation12]  }
  0x50   :  { %v205_v57 = vadd.f32 %v204_v55, %v199_v59  ;;  %v206_v58 = vadd.f32 %v204_v55, %v200_v60  ;;  %v207_v17 = vadd.f32 %v204_v55, %v201_v63  ;;  %v208_v18 = vadd.f32 %v204_v55, %v202_v9  ;;  %s914_s14 = sld [smem:[#allocation9 + $0x6]] }
  0x51   :  { %v225_v19 = vmul.f32 %v224_v15, %v723_v0  ;;  %v226_v20 = vmul.f32 %v224_v15, %v727_v1  ;;  %v227_v61 = vmul.f32 %v224_v15, %v729_v2  ;;  %v228_v62 = vmul.f32 %v224_v15, %v731_v3  ;;  %s920_s15 = sld [smem:[#allocation3 + $0x7]] }
  0x52   :  { %v209_v21 = vmax.f32 %v205_v57, 0.0  ;;  %v210_v22 = vmax.f32 %v206_v58, 0.0  ;;  %v211_v23 = vmax.f32 %v207_v17, 0.0  ;;  %v212_v24 = vmax.f32 %v208_v18, 0.0  ;;  %s922_s16 = sld [smem:[#allocation3 + $0x87]] }
  0x53   :  { %v231_v25 = vmul.f32 %v230_v16, %v735_v4  ;;  %v232_v26 = vmul.f32 %v230_v16, %v737_v5  ;;  %v233_v27 = vmul.f32 %v230_v16, %v741_v6  ;;  %v234_v28 = vmul.f32 %v230_v16, %v743_v7  ;;  %s928_s17 = sld [smem:[#allocation3 + $0x107]] }
  0x54   :  { %v215_v29 = vmul.f32 %v214_v56, %v209_v21  ;;  %v216_v30 = vmul.f32 %v214_v56, %v210_v22  ;;  %v217_v37 = vmul.f32 %v214_v56, %v211_v23  ;;  %v218_v38 = vmul.f32 %v214_v56, %v212_v24  ;;  %s934_s18 = sld [smem:[#allocation8 + $0x7]] }
  0x55   :  { %v235_v33 = vadd.f32 %v231_v25, %v225_v19  ;;  %v236_v34 = vadd.f32 %v232_v26, %v226_v20  ;;  %v237_v35 = vadd.f32 %v233_v27, %v227_v61  ;;  %v238_v36 = vadd.f32 %v234_v28, %v228_v62  ;;  %s938_s19 = sld [smem:[#allocation9 + $0x7]] }
  0x56   :  { %v219_v39 = vadd.f32 %v215_v29, %v173_v53  ;;  %v220_v40 = vadd.f32 %v216_v30, %v174_v54  ;;  %v241_v41 = vmul.f32 %v240_v31, %v745_v8  ;;  %v242_v42 = vmul.f32 %v240_v31, %v747_v10  ;;  %s940_s20 = sld [smem:[#allocation3 + $0x8]] }
  0x57   :  { %v243_v43 = vmul.f32 %v240_v31, %v749_v11  ;;  %v244_v44 = vmul.f32 %v240_v31, %v751_v12  ;;  %v260_v45 = vstv %s824_s28  ;;  %v270_v46 = vstv %s826_s1  ;;  %s948_s21 = sld [smem:[#allocation3 + $0x88]]  ;;  %s523_s28 = sshll.u32 %s680_s27, 4  ;;  %s524_s28 = int_to_ptr.vmem [resolvable:$true] %s523_s28 }
  0x58   :  { %v276_v47 = vstv %s834_s0  ;;  %v286_v48 = vstv %s836_s29  ;;  %v245_v49 = vadd.f32 %v241_v41, %v235_v33  ;;  %v246_v50 = vadd.f32 %v242_v42, %v236_v34  ;;  %s950_s22 = sld [smem:[#allocation3 + $0x108]]  ;;  %p649_p2 = scmp.lt.s32.totalorder %s524_s28, %s524_s28 }
  0x59   :  { %v247_v51 = vadd.f32 %v243_v43, %v237_v35  ;;  %v248_v52 = vadd.f32 %v244_v44, %v238_v36  ;;  %v271_v53 = vmul.f32 %v270_v46, %v723_v0  ;;  %v272_v54 = vmul.f32 %v270_v46, %v727_v1  ;;  %s974_s23 = sld [smem:[#allocation8 + $0x8]] }
  0x5a   :  { %v273_v55 = vmul.f32 %v270_v46, %v729_v2  ;;  %v274_v56 = vmul.f32 %v270_v46, %v731_v3  ;;  %v251_v59 = vadd.f32 %v250_v32, %v245_v49  ;;  %v252_v60 = vadd.f32 %v250_v32, %v246_v50  ;;  %s576_s24 = sld [smem:[#allocation9 + $0x8]] }
  0x5b   :  { %v253_v63 = vadd.f32 %v250_v32, %v247_v51  ;;  %v254_v9 = vadd.f32 %v250_v32, %v248_v52  ;;  %v277_v15 = vmul.f32 %v276_v47, %v735_v4  ;;  %v278_v16 = vmul.f32 %v276_v47, %v737_v5 }
  0x5c   :  { %v279_v57 = vmul.f32 %v276_v47, %v741_v6  ;;  %v280_v58 = vmul.f32 %v276_v47, %v743_v7  ;;  %v255_v17 = vmax.f32 %v251_v59, 0.0  ;;  %v256_v18 = vmax.f32 %v252_v60, 0.0 }
  0x5d   :  { %v257_v19 = vmax.f32 %v253_v63, 0.0  ;;  %v258_v20 = vmax.f32 %v254_v9, 0.0  ;;  %v281_v61 = vadd.f32 %v277_v15, %v271_v53  ;;  %v282_v62 = vadd.f32 %v278_v16, %v272_v54 }
  0x5e   :  { %v283_v21 = vadd.f32 %v279_v57, %v273_v55  ;;  %v284_v22 = vadd.f32 %v280_v58, %v274_v56  ;;  %v221_v23 = vadd.f32 %v217_v37, %v828_v13  ;;  %v222_v24 = vadd.f32 %v218_v38, %v830_v14 }
  0x5f   :  { %v261_v25 = vmul.f32 %v260_v45, %v255_v17  ;;  %v262_v26 = vmul.f32 %v260_v45, %v256_v18  ;;  %v287_v27 = vmul.f32 %v286_v48, %v745_v8  ;;  %v288_v28 = vmul.f32 %v286_v48, %v747_v10 }
  0x60   :  { %v289_v29 = vmul.f32 %v286_v48, %v749_v11  ;;  %v290_v30 = vmul.f32 %v286_v48, %v751_v12  ;;  %v263_v31 = vmul.f32 %v260_v45, %v257_v19  ;;  %v264_v32 = vmul.f32 %v260_v45, %v258_v20 }
  0x61   :  { %v265_v33 = vadd.f32 %v261_v25, %v219_v39  ;;  %v266_v13 = vadd.f32 %v262_v26, %v220_v40  ;;  %v291_v34 = vadd.f32 %v287_v27, %v281_v61  ;;  %v292_v14 = vadd.f32 %v288_v28, %v282_v62 }
  0x62   :  { %v293_v35 = vadd.f32 %v289_v29, %v283_v21  ;;  %v294_v36 = vadd.f32 %v290_v30, %v284_v22  ;;  %v296_v37 = vstv %s856_s30  ;;  %v306_v38 = vstv %s858_s6 }
  0x63   :  { %v316_v41 = vstv %s864_s2  ;;  %v322_v42 = vstv %s866_s7  ;;  %v297_v43 = vadd.f32 %v296_v37, %v291_v34  ;;  %v298_v44 = vadd.f32 %v296_v37, %v292_v14 }
  0x64   :  { %v299_v46 = vadd.f32 %v296_v37, %v293_v35  ;;  %v300_v47 = vadd.f32 %v296_v37, %v294_v36  ;;  %v317_v39 = vmul.f32 %v316_v41, %v723_v0  ;;  %v318_v40 = vmul.f32 %v316_v41, %v727_v1 }
  0x65   :  { %v319_v45 = vmul.f32 %v316_v41, %v729_v2  ;;  %v320_v48 = vmul.f32 %v316_v41, %v731_v3  ;;  %v301_v49 = vmax.f32 %v297_v43, 0.0  ;;  %v302_v50 = vmax.f32 %v298_v44, 0.0 }
  0x66   :  { %v303_v51 = vmax.f32 %v299_v46, 0.0  ;;  %v304_v52 = vmax.f32 %v300_v47, 0.0  ;;  %v323_v53 = vmul.f32 %v322_v42, %v735_v4  ;;  %v324_v54 = vmul.f32 %v322_v42, %v737_v5 }
  0x67   :  { %v325_v55 = vmul.f32 %v322_v42, %v741_v6  ;;  %v326_v56 = vmul.f32 %v322_v42, %v743_v7  ;;  %v307_v59 = vmul.f32 %v306_v38, %v301_v49  ;;  %v308_v60 = vmul.f32 %v306_v38, %v302_v50 }
  0x68   :  { %v267_v63 = vadd.f32 %v263_v31, %v221_v23  ;;  %v268_v9 = vadd.f32 %v264_v32, %v222_v24  ;;  %v309_v15 = vmul.f32 %v306_v38, %v303_v51  ;;  %v310_v16 = vmul.f32 %v306_v38, %v304_v52 }
  0x69   :  { %v327_v57 = vadd.f32 %v323_v53, %v317_v39  ;;  %v328_v58 = vadd.f32 %v324_v54, %v318_v40  ;;  %v329_v17 = vadd.f32 %v325_v55, %v319_v45  ;;  %v330_v18 = vadd.f32 %v326_v56, %v320_v48 }
  0x6a   :  { %v311_v19 = vadd.f32 %v307_v59, %v265_v33  ;;  %v312_v20 = vadd.f32 %v308_v60, %v266_v13  ;;  %v332_v61 = vstv %s878_s8  ;;  %v362_v62 = vstv %s884_s9 }
  0x6b   :  { %v333_v21 = vmul.f32 %v332_v61, %v745_v8  ;;  %v334_v22 = vmul.f32 %v332_v61, %v747_v10  ;;  %v335_v23 = vmul.f32 %v332_v61, %v749_v11  ;;  %v336_v24 = vmul.f32 %v332_v61, %v751_v12 }
  0x6c   :  { %v342_v25 = vstv %s886_s10  ;;  %v352_v26 = vstv %s892_s11  ;;  %v363_v27 = vmul.f32 %v362_v62, %v723_v0  ;;  %v364_v28 = vmul.f32 %v362_v62, %v727_v1 }
  0x6d   :  { %v337_v29 = vadd.f32 %v333_v21, %v327_v57  ;;  %v338_v30 = vadd.f32 %v334_v22, %v328_v58  ;;  %v339_v31 = vadd.f32 %v335_v23, %v329_v17  ;;  %v340_v32 = vadd.f32 %v336_v24, %v330_v18 }
  0x6e   :  { %v365_v33 = vmul.f32 %v362_v62, %v729_v2  ;;  %v366_v13 = vmul.f32 %v362_v62, %v731_v3  ;;  %v368_v34 = vstv %s894_s12  ;;  %v378_v14 = vstv %s900_s13 }
  0x6f   :  { %v343_v35 = vadd.f32 %v342_v25, %v337_v29  ;;  %v344_v36 = vadd.f32 %v342_v25, %v338_v30  ;;  %v345_v37 = vadd.f32 %v342_v25, %v339_v31  ;;  %v346_v38 = vadd.f32 %v342_v25, %v340_v32 }
  0x70   :  { %v369_v41 = vmul.f32 %v368_v34, %v735_v4  ;;  %v370_v42 = vmul.f32 %v368_v34, %v737_v5  ;;  %v371_v43 = vmul.f32 %v368_v34, %v741_v6  ;;  %v372_v44 = vmul.f32 %v368_v34, %v743_v7 }
  0x71   :  { %v347_v46 = vmax.f32 %v343_v35, 0.0  ;;  %v348_v47 = vmax.f32 %v344_v36, 0.0  ;;  %v349_v39 = vmax.f32 %v345_v37, 0.0  ;;  %v350_v40 = vmax.f32 %v346_v38, 0.0 }
  0x72   :  { %v373_v45 = vadd.f32 %v369_v41, %v363_v27  ;;  %v374_v48 = vadd.f32 %v370_v42, %v364_v28  ;;  %v375_v49 = vadd.f32 %v371_v43, %v365_v33  ;;  %v376_v50 = vadd.f32 %v372_v44, %v366_v13 }
  0x73   :  { %v313_v51 = vadd.f32 %v309_v15, %v267_v63  ;;  %v314_v52 = vadd.f32 %v310_v16, %v268_v9  ;;  %v353_v53 = vmul.f32 %v352_v26, %v347_v46  ;;  %v354_v54 = vmul.f32 %v352_v26, %v348_v47 }
  0x74   :  { %v379_v55 = vmul.f32 %v378_v14, %v745_v8  ;;  %v380_v56 = vmul.f32 %v378_v14, %v747_v10  ;;  %v381_v59 = vmul.f32 %v378_v14, %v749_v11  ;;  %v382_v60 = vmul.f32 %v378_v14, %v751_v12 }
  0x75   :  { %v355_v57 = vmul.f32 %v352_v26, %v349_v39  ;;  %v356_v58 = vmul.f32 %v352_v26, %v350_v40  ;;  %v388_v63 = vstv %s912_s4  ;;  %v398_v9 = vstv %s914_s14 }
  0x76   :  { %v383_v15 = vadd.f32 %v379_v55, %v373_v45  ;;  %v384_v16 = vadd.f32 %v380_v56, %v374_v48  ;;  %v385_v17 = vadd.f32 %v381_v59, %v375_v49  ;;  %v386_v18 = vadd.f32 %v382_v60, %v376_v50 }
  0x77   :  { %v942_v61 = vadd.f32 %v353_v53, %v311_v19  ;;  %v944_v62 = vadd.f32 %v354_v54, %v312_v20  ;;  %v408_v21 = vstv %s920_s15  ;;  %v414_v22 = vstv %s922_s16 }
  0x78   :  { %v389_v23 = vadd.f32 %v388_v63, %v383_v15  ;;  %v390_v24 = vadd.f32 %v388_v63, %v384_v16  ;;  %v391_v25 = vadd.f32 %v388_v63, %v385_v17  ;;  %v392_v26 = vadd.f32 %v388_v63, %v386_v18 }
  0x79   :  { %v409_v27 = vmul.f32 %v408_v21, %v723_v0  ;;  %v410_v28 = vmul.f32 %v408_v21, %v727_v1  ;;  %v411_v19 = vmul.f32 %v408_v21, %v729_v2  ;;  %v412_v20 = vmul.f32 %v408_v21, %v731_v3 }
  0x7a   :  { %v393_v29 = vmax.f32 %v389_v23, 0.0  ;;  %v394_v30 = vmax.f32 %v390_v24, 0.0  ;;  %v395_v31 = vmax.f32 %v391_v25, 0.0  ;;  %v396_v32 = vmax.f32 %v392_v26, 0.0 }
  0x7b   :  { %v415_v33 = vmul.f32 %v414_v22, %v735_v4  ;;  %v416_v13 = vmul.f32 %v414_v22, %v737_v5  ;;  %v417_v34 = vmul.f32 %v414_v22, %v741_v6  ;;  %v418_v14 = vmul.f32 %v414_v22, %v743_v7 }
  0x7c   :  { %v359_v35 = vadd.f32 %v355_v57, %v313_v51  ;;  %v360_v36 = vadd.f32 %v356_v58, %v314_v52  ;;  %v424_v37 = vstv %s928_s17  ;;  %v434_v38 = vstv %s934_s18 }
  0x7d   :  { %v419_v41 = vadd.f32 %v415_v33, %v409_v27  ;;  %v420_v42 = vadd.f32 %v416_v13, %v410_v28  ;;  %v421_v43 = vadd.f32 %v417_v34, %v411_v19  ;;  %v422_v44 = vadd.f32 %v418_v14, %v412_v20 }
  0x7e   :  { %v399_v46 = vmul.f32 %v398_v9, %v393_v29  ;;  %v400_v47 = vmul.f32 %v398_v9, %v394_v30  ;;  %v401_v39 = vmul.f32 %v398_v9, %v395_v31  ;;  %v402_v40 = vmul.f32 %v398_v9, %v396_v32 }
  0x7f   :  { %v425_v45 = vmul.f32 %v424_v37, %v745_v8  ;;  %v426_v48 = vmul.f32 %v424_v37, %v747_v10  ;;  %v427_v49 = vmul.f32 %v424_v37, %v749_v11  ;;  %v428_v50 = vmul.f32 %v424_v37, %v751_v12 }
  0x80   :  { %v444_v51 = vstv %s938_s19  ;;  %v454_v52 = vstv %s940_s20  ;;  %v460_v53 = vstv %s948_s21  ;;  %v470_v54 = vstv %s950_s22 }
  0x81   :  { %v429_v55 = vadd.f32 %v425_v45, %v419_v41  ;;  %v430_v56 = vadd.f32 %v426_v48, %v420_v42  ;;  %v431_v59 = vadd.f32 %v427_v49, %v421_v43  ;;  %v432_v60 = vadd.f32 %v428_v50, %v422_v44 }
  0x82   :  { %v455_v57 = vmul.f32 %v454_v52, %v723_v0  ;;  %v456_v58 = vmul.f32 %v454_v52, %v727_v1  ;;  %v457_v63 = vmul.f32 %v454_v52, %v729_v2  ;;  %v458_v9 = vmul.f32 %v454_v52, %v731_v3 }
  0x83   :  { %v435_v15 = vadd.f32 %v434_v38, %v429_v55  ;;  %v436_v16 = vadd.f32 %v434_v38, %v430_v56  ;;  %v437_v17 = vadd.f32 %v434_v38, %v431_v59  ;;  %v438_v18 = vadd.f32 %v434_v38, %v432_v60 }
  0x84   :  { %v461_v21 = vmul.f32 %v460_v53, %v735_v4  ;;  %v462_v22 = vmul.f32 %v460_v53, %v737_v5  ;;  %v463_v23 = vmul.f32 %v460_v53, %v741_v6  ;;  %v464_v0 = vmul.f32 %v460_v53, %v743_v7 }
  0x85   :  { %v439_v24 = vmax.f32 %v435_v15, 0.0  ;;  %v440_v1 = vmax.f32 %v436_v16, 0.0  ;;  %v441_v25 = vmax.f32 %v437_v17, 0.0  ;;  %v442_v2 = vmax.f32 %v438_v18, 0.0 }
  0x86   :  { %v465_v3 = vadd.f32 %v461_v21, %v455_v57  ;;  %v466_v26 = vadd.f32 %v462_v22, %v456_v58  ;;  %v467_v27 = vadd.f32 %v463_v23, %v457_v63  ;;  %v468_v28 = vadd.f32 %v464_v0, %v458_v9 }
  0x87   :  { %v403_v19 = vadd.f32 %v399_v46, %v942_v61  ;;  %v404_v20 = vadd.f32 %v400_v47, %v944_v62  ;;  %v405_v4 = vadd.f32 %v401_v39, %v359_v35  ;;  %v445_v5 = vmul.f32 %v444_v51, %v439_v24 }
  0x88   :  { %v471_v6 = vmul.f32 %v470_v54, %v745_v8  ;;  %v472_v7 = vmul.f32 %v470_v54, %v747_v10  ;;  %v473_v29 = vmul.f32 %v470_v54, %v749_v11  ;;  %v474_v30 = vmul.f32 %v470_v54, %v751_v12 }
  0x89   :  { %v406_v31 = vadd.f32 %v402_v40, %v360_v36  ;;  %v446_v32 = vmul.f32 %v444_v51, %v440_v1  ;;  %v447_v33 = vmul.f32 %v444_v51, %v441_v25  ;;  %v448_v13 = vmul.f32 %v444_v51, %v442_v2 }
  0x8a   :  { %v475_v34 = vadd.f32 %v471_v6, %v465_v3  ;;  %v476_v14 = vadd.f32 %v472_v7, %v466_v26  ;;  %v477_v61 = vadd.f32 %v473_v29, %v467_v27  ;;  %v478_v37 = vadd.f32 %v474_v30, %v468_v28 }
  0x8b   :  { %v449_v62 = vadd.f32 %v445_v5, %v403_v19  ;;  %v480_v38 = vstv %s974_s23  ;;  %v450_v43 = vadd.f32 %v446_v32, %v404_v20  ;;  %v451_v10 = vadd.f32 %v447_v33, %v405_v4 }
  0x8c   :  { %v481_v35 = vadd.f32 %v480_v38, %v475_v34  ;;  %v482_v41 = vadd.f32 %v480_v38, %v476_v14  ;;  %v483_v42 = vadd.f32 %v480_v38, %v477_v61  ;;  %v484_v8 = vadd.f32 %v480_v38, %v478_v37 }
  0x8d   :  { %v452_v44 = vadd.f32 %v448_v13, %v406_v31  ;;  %v490_v11 = vstv %s576_s24  ;;  %v500_v49 = vstv %s996_s3  ;;  %s644_s3 = scalar_lea.vmem %s524_s28, 512 }
  0x8e   :  { %v485_v46 = vmax.f32 %v481_v35, 0.0  ;;  %v486_v12 = vmax.f32 %v482_v41, 0.0  ;;  %v487_v36 = vmax.f32 %v483_v42, 0.0  ;;  %v488_v47 = vmax.f32 %v484_v8, 0.0  ;;  %p645_p1 = scmp.ne.s32.totalorder %s524_s28, %s644_s3  ;;  %p650_p3 = scmp.lt.s32.totalorder %s644_s3, %s644_s3 }
  0x90   :  { %v491_v39 = vmul.f32 %v490_v11, %v485_v46  ;;  %v492_v40 = vmul.f32 %v490_v11, %v486_v12  ;;  %v493_v45 = vmul.f32 %v490_v11, %v487_v36  ;;  %v494_v48 = vmul.f32 %v490_v11, %v488_v47  ;;  %p651_p4 = por %p650_p3, %p649_p2 }
  0x92   :  { %v495_v50 = vadd.f32 %v491_v39, %v449_v62  ;;  %v496_v51 = vadd.f32 %v492_v40, %v450_v43  ;;  %v497_v52 = vadd.f32 %v493_v45, %v451_v10  ;;  %v498_v53 = vadd.f32 %v494_v48, %v452_v44  ;;  %p652_p5 = pnand %p651_p4, %p645_p1 }
  0x94   :  { %v501_v54 = vadd.f32 %v500_v49, %v495_v50  ;;  %v502_v55 = vadd.f32 %v500_v49, %v496_v51  ;;  %v503_v56 = vadd.f32 %v500_v49, %v497_v52  ;;  %v504_v59 = vadd.f32 %v500_v49, %v498_v53 }
  0x96   :  { %584 = vtanh.f32 %v501_v54 }
  0x97   :  { %586 = vtanh.f32 %v502_v55 }
  0x98   :  { %588 = vtanh.f32 %v503_v56 }
  0x99   :  { %590 = vtanh.f32 %v504_v59 }
  0xa3   :  { %v585_v60 = vpop.eup %584 }
  0xa4   :  { %v587_v57 = vpop.eup %586  ;;  %v509_v58 = vmul.f32 2.0, %v585_v60 }
  0xa5   :  { %v589_v63 = vpop.eup %588  ;;  %v510_v9 = vmul.f32 2.0, %v587_v57 }
  0xa6   :  { %v591_v15 = vpop.eup %590  ;;  %v511_v16 = vmul.f32 2.0, %v589_v63  ;;  %513 = vst [vmem:[#allocation12] sm:$0xff] %v509_v58 }
  0xa7   :  { %v512_v17 = vmul.f32 2.0, %v591_v15  ;;  %514 = vst [vmem:[#allocation12 + $0x8] sm:$0xff] %v510_v9 }
  0xa8   :  { %515 = vst [vmem:[#allocation12 + $0x10] sm:$0xff] %v511_v16 }
  0xa9   :  { %516 = vst [vmem:[#allocation12 + $0x18] sm:$0xff] %v512_v17 }
  0xaa   :  { %655 = shalt.err (!%p652_p5)
}
  0xab   :  { %526 = dma.vmem_to_hbm [thread:$0]  %s524_s28, 512, %s998_s5, [#allocation5]  }
  0xac   :  { %672 = dma.done.wait [#allocation5], 512  }
  0xad   :  { %673 = vsyncadd [#allocation5], 4294966784 }
  0xae   :  { %530 = vsyncpa [#allocation4], 1 }
  0xaf   :  { %531 = vsyncpa [#allocation5], 1 }
  0xb0   :  { %532 = vsyncpa [#allocation6], 1 }
  0xb1   :  { %533 = vsyncpa [#allocation7], 1 }
  0xb2   :  { %534 = vsyncpa [#allocation10], 1 }

</bundles_post_ra>
